<compile_context>
chip_gen: v7x
topology: tpu7x:2x2x1
jax: 0.10.0
libtpu: 0.0.40
codegen_flags: <defaults>
</compile_context>

<pallas_src>
import jax
import jax.numpy as jnp
from jax import lax
from jax.experimental import pallas as pl
from jax.experimental.pallas import tpu as pltpu

EPS = 1.0e-05  # RelevancePropagationConv2d.eps in the reference repo


# --------------------------------------------------------------------------
# Fused forward + LRP sweep
# --------------------------------------------------------------------------

def lrp_modules_forward(x_nchw, params, out_relevance=None):
    """Mirrors LRPModules.forward for layers = [Conv, ReLU, Conv, ReLU].

    x_nchw: (N, Cin, H, W).  params = ((w1_hwio, b1), (w2_hwio, b2)).
    out_relevance: optional (N, Cmid, H, W) override of the initial relevance.
    """
    (w1, b1), (w2, b2) = params
    N, Cin, H, W_ = x_nchw.shape
    Cmid = w1.shape[-1]
    HW = H * W_
    use_r0 = out_relevance is not None
    f32 = jnp.float32

    assert Cmid % 8 == 0 and HW % 128 == 0, "tile alignment (8 sublanes, 128 lanes)"
    assert Cin <= Cmid and 9 * Cin + 1 <= 9 * Cmid, "weight-slab packing assumes Cin <= Cmid"

    KP = 9 * Cmid        # patch rows for a Cmid-channel activation (72)
    K1 = 9 * Cin + 1     # conv1 patch rows incl. the ones/bias row (37)

    # ---------------- wrapper-side constant prep (pure XLA, batch-free) ----
    w1f, w2f = w1.astype(f32), w2.astype(f32)
    w1p, w2p = jnp.maximum(w1f, 0.0), jnp.maximum(w2f, 0.0)          # z+ rule
    w1t = jnp.transpose(w1p[::-1, ::-1], (0, 1, 3, 2))               # (3,3,Cmid,Cin)
    w2t = jnp.transpose(w2p[::-1, ::-1], (0, 1, 3, 2))               # (3,3,Cmid,Cmid)

    # weight slab (5*Cmid, KP): every matrix transposed to (Cout, K) so convs
    # are W(Cout,K) @ patches(K,HW) with HW on lanes.
    w1b = jnp.concatenate([w1f.reshape(9 * Cin, Cmid).T,
                           b1.astype(f32)[:, None]], axis=1)         # (Cmid, K1)
    w1b = jnp.pad(w1b, ((0, 0), (0, KP - K1)))
    w2fwd = w2f.reshape(KP, Cmid).T                                  # conv2 fwd
    w2plus = w2p.reshape(KP, Cmid).T                                 # conv2 z+
    w2grad = w2t.reshape(KP, Cmid).T                                 # conv2 grad
    w1grad = jnp.pad(w1t.reshape(KP, Cin).T, ((0, Cmid - Cin), (0, 0)))  # conv1 grad, zero-padded out-chans
    wslab = jnp.concatenate([w1b, w2fwd, w2plus, w2grad, w1grad], axis=0)  # (40, 72)

    # batch-constant 1/(conv(ones, w1+) + eps), shape (Cmid, HW)
    ones_img = jnp.ones((1, H, W_, Cin), f32)
    z1 = lax.conv_general_dilated(ones_img, w1p, (1, 1), ((1, 1), (1, 1)),
                                  dimension_numbers=("NHWC", "HWIO", "NHWC")) + EPS
    inv_z1 = jnp.transpose(1.0 / z1[0], (2, 0, 1)).reshape(Cmid, HW)

    # b2 broadcast over lanes + 9 tap edge masks (built once, wrapper-side)
    b2b = jnp.broadcast_to(b2.astype(f32)[:, None], (Cmid, HW))
    xs = jnp.arange(HW, dtype=jnp.int32) % W_
    ys = jnp.arange(HW, dtype=jnp.int32) // W_
    mask_rows = []
    for dy in (-1, 0, 1):
        for dx in (-1, 0, 1):
            ok = ((xs + dx >= 0) & (xs + dx <= W_ - 1) &
                  (ys + dy >= 0) & (ys + dy <= H - 1))
            mask_rows.append(ok.astype(f32))
    cslab = jnp.concatenate([inv_z1, b2b, jnp.stack(mask_rows, axis=0)], axis=0)  # (25, HW)

    # segment-sum matrix for softmax over W: denom = e @ smat broadcasts the
    # per-(c, y) sums back over all x positions in one MXU dot.
    seg = jnp.arange(HW) // W_
    smat = (seg[:, None] == seg[None, :]).astype(f32)                # (HW, HW)

    # im2col patches of the raw input, wrapper-side: (N, KP, HW) with a ones
    # row (for the folded conv1 bias) and zero padding rows.
    xt = jnp.transpose(x_nchw, (0, 2, 3, 1)).astype(f32)             # (N,H,W,Cin)
    xp = jnp.pad(xt, ((0, 0), (1, 1), (1, 1), (0, 0)))
    taps = [xp[:, ky:ky + H, kx:kx + W_, :] for ky in range(3) for kx in range(3)]
    px = jnp.concatenate(taps, axis=-1).reshape(N, HW, 9 * Cin)      # row = y*W+x, col = tap*Cin+ci
    px = jnp.transpose(px, (0, 2, 1))                                # (N, 9*Cin, HW)
    px = jnp.concatenate([px, jnp.ones((N, 1, HW), f32),
                          jnp.zeros((N, KP - K1, HW), f32)], axis=1)  # (N, KP, HW)

    # ---------------- kernel -----------------------------------------------
    def kernel(*refs):
        if use_r0:
            px_ref, r0_ref, w_ref, c_ref, o_ref = refs
            s_ref = None
        else:
            px_ref, w_ref, c_ref, s_ref, o_ref = refs

        def build_patches(a):
            # (Cmid, HW) -> (9*Cmid, HW): 3x3 / pad-1 taps via lane rotations
            # masked at the image edges; each tap is an aligned 8-sublane piece.
            rows, t = [], 0
            for dy in (-1, 0, 1):
                for dx in (-1, 0, 1):
                    if dy == 0 and dx == 0:
                        rows.append(a)
                    else:
                        off = dy * W_ + dx
                        rolled = pltpu.roll(a, shift=(-off) % HW, axis=1)
                        rows.append(rolled * c_ref[2 * Cmid + t:2 * Cmid + t + 1, :])
                    t += 1
            return jnp.concatenate(rows, axis=0)

        # ---- standard inference (torch.no_grad loop), conv1 bias folded ----
        a1 = jnp.maximum(
            jnp.dot(w_ref[0:Cmid, :], px_ref[0],
                    preferred_element_type=jnp.float32), 0.0)        # (Cmid, HW)

        pa1 = build_patches(a1)                                      # (72, HW)

        # ---- initial relevance ----
        if use_r0:
            r = r0_ref[0]
            z2 = jnp.dot(w_ref[2 * Cmid:3 * Cmid, :], pa1,
                         preferred_element_type=jnp.float32) + EPS
        else:
            # conv2 forward and conv2 z+ share patches(a1): one packed dot
            zz = jnp.dot(w_ref[Cmid:3 * Cmid, :], pa1,
                         preferred_element_type=jnp.float32)         # (2*Cmid, HW)
            a2 = jnp.maximum(zz[0:Cmid] + c_ref[Cmid:2 * Cmid, :], 0.0)
            z2 = zz[Cmid:2 * Cmid] + EPS
            # torch.softmax(a2_NCHW, dim=-1) == softmax over W; global-max shift
            # is exact for softmax, segment sums come back broadcast via the MXU.
            m = jnp.max(jnp.max(a2, axis=1, keepdims=True), axis=0, keepdims=True)
            e = jnp.exp(a2 - m)
            den = jnp.dot(e, s_ref[...], preferred_element_type=jnp.float32)
            r = e / den

        # ---- LRP z+ step through conv2 (ReLUs pass relevance through) ----
        s2 = r / z2
        c2 = jnp.dot(w_ref[3 * Cmid:4 * Cmid, :], build_patches(s2),
                     preferred_element_type=jnp.float32)             # (Cmid, HW)
        r = a1 * c2

        # ---- LRP z+ step through conv1: z-term is batch-constant 1/z1 ----
        s1 = r * c_ref[0:Cmid, :]
        c1 = jnp.dot(w_ref[4 * Cmid:5 * Cmid, :], build_patches(s1),
                     preferred_element_type=jnp.float32)             # rows >= Cin are exactly 0

        # permute(0,2,3,1).sum(dim=-1): channel (sublane) sum, lane-dense store
        o_ref[0, 0, :] = jnp.sum(c1, axis=0)

    # ---------------- pallas_call ------------------------------------------
    in_arrays = [px]
    in_specs = [pl.BlockSpec((1, KP, HW), lambda n: (n, 0, 0))]
    if use_r0:
        r0 = out_relevance.astype(f32).reshape(N, Cmid, HW)
        in_arrays.append(r0)
        in_specs.append(pl.BlockSpec((1, Cmid, HW), lambda n: (n, 0, 0)))
    in_arrays += [wslab, cslab]
    in_specs += [pl.BlockSpec(wslab.shape, lambda n: (0, 0)),
                 pl.BlockSpec(cslab.shape, lambda n: (0, 0))]
    if not use_r0:
        in_arrays.append(smat)
        in_specs.append(pl.BlockSpec(smat.shape, lambda n: (0, 0)))

    out = pl.pallas_call(
        kernel,
        out_shape=jax.ShapeDtypeStruct((N, 1, HW), f32),
        grid=(N,),
        in_specs=in_specs,
        out_specs=pl.BlockSpec((1, 1, HW), lambda n: (n, 0, 0)),
        compiler_params=pltpu.CompilerParams(dimension_semantics=("parallel",)),
    )(*in_arrays)

    # torch .squeeze() also drops the batch dim when N == 1 (kept for parity)
    return jnp.squeeze(out.reshape(N, H, W_))


# --------------------------------------------------------------------------
# Pure-JAX reference (numerical sanity check only)
# --------------------------------------------------------------------------

def _ref_conv(x, w, b):
    return lax.conv_general_dilated(
        x, w, (1, 1), ((1, 1), (1, 1)),
        dimension_numbers=("NHWC", "HWIO", "NHWC")) + b


def _reference(x_nchw, params, out_relevance=None):
    (w1, b1), (w2, b2) = params
    x = jnp.transpose(x_nchw, (0, 2, 3, 1)).astype(jnp.float32)
    a0 = jnp.ones_like(x)
    a1 = jnp.maximum(_ref_conv(x, w1, b1), 0.0)
    a2 = jnp.maximum(_ref_conv(a1, w2, b2), 0.0)
    if out_relevance is not None:
        r = jnp.transpose(out_relevance, (0, 2, 3, 1)).astype(jnp.float32)
    else:
        r = jax.nn.softmax(a2, axis=2)   # softmax over W (torch dim=-1 on NCHW)

    def step(a_in, r_out, w):
        wp = jnp.maximum(w, 0.0)
        z = _ref_conv(a_in, wp, jnp.full((w.shape[-1],), EPS, jnp.float32))
        s = r_out / z
        wt = jnp.transpose(wp[::-1, ::-1], (0, 1, 3, 2))
        c = _ref_conv(s, wt, jnp.zeros((w.shape[2],), jnp.float32))
        return a_in * c

    r = step(a1, r, w2)
    r = step(a0, r, w1)
    return jnp.squeeze(jnp.sum(r, axis=-1))


# --------------------------------------------------------------------------

if __name__ == "__main__":
    key = jax.random.PRNGKey(0)
    k_x, k_w1, k_b1, k_w2, k_b2 = jax.random.split(key, 5)

    N, C, H, W = 2, 4, 16, 16
    C1 = 8

    x = jax.random.normal(k_x, (N, C, H, W), jnp.float32)            # NCHW input
    w1 = 0.1 * jax.random.normal(k_w1, (3, 3, C, C1), jnp.float32)   # HWIO
    b1 = 0.05 * jax.random.normal(k_b1, (C1,), jnp.float32)
    w2 = 0.1 * jax.random.normal(k_w2, (3, 3, C1, C1), jnp.float32)  # HWIO
    b2 = 0.05 * jax.random.normal(k_b2, (C1,), jnp.float32)
    params = ((w1, b1), (w2, b2))

    # --- default path (out_relevance=None -> in-kernel softmax over W) ---
    fwd = jax.jit(lambda xx: lrp_modules_forward(xx, params))
    out = jax.block_until_ready(fwd(x))
    assert out.shape == (N, H, W), out.shape

    ref = _reference(x, params)
    rel_err = float(jnp.max(jnp.abs(out - ref)) / (jnp.max(jnp.abs(ref)) + 1e-8))
    assert rel_err < 1e-2, f"mismatch vs reference (out_relevance=None): rel_err={rel_err}"

    # --- out_relevance override path ---
    r0 = jnp.ones((N, C1, H, W), jnp.float32)
    fwd_r0 = jax.jit(lambda xx, rr: lrp_modules_forward(xx, params, out_relevance=rr))
    out_r0 = jax.block_until_ready(fwd_r0(x, r0))
    ref_r0 = _reference(x, params, out_relevance=r0)
    rel_err_r0 = float(jnp.max(jnp.abs(out_r0 - ref_r0)) / (jnp.max(jnp.abs(ref_r0)) + 1e-8))
    assert rel_err_r0 < 1e-2, f"mismatch vs reference (out_relevance set): rel_err={rel_err_r0}"

    print("KERNEL_OK")
</pallas_src>

<mosaic_0001>
module attributes {stable_mosaic.version = 11 : i64} {
  func.func @kernel(%arg0: i32, %arg1: memref<1x72x256xf32, #tpu.memory_space<vmem>>, %arg2: memref<40x72xf32, #tpu.memory_space<vmem>>, %arg3: memref<25x256xf32, #tpu.memory_space<vmem>>, %arg4: memref<256x256xf32, #tpu.memory_space<vmem>>, %arg5: memref<1x1x256xf32, #tpu.memory_space<vmem>>) attributes {dimension_semantics = [#tpu.dimension_semantics<parallel>], iteration_bounds = array<i64: 2>, scalar_prefetch = 0 : i64, scratch_operands = 0 : i64, tpu.core_type = #tpu.core_type<tc>, window_params = [{transform_indices = @transform_0, window_bounds = array<i64: 1, 72, 256>}, {pipeline_mode = #tpu.pipeline_mode<synchronous>, transform_indices = @transform_1, window_bounds = array<i64: 40, 72>}, {pipeline_mode = #tpu.pipeline_mode<synchronous>, transform_indices = @transform_2, window_bounds = array<i64: 25, 256>}, {pipeline_mode = #tpu.pipeline_mode<synchronous>, transform_indices = @transform_3, window_bounds = array<i64: 256, 256>}, {transform_indices = @transform_4, window_bounds = array<i64: 1, 1, 256>}]} {
    %c0 = arith.constant 0 : index
    %c0_0 = arith.constant 0 : index
    %0 = vector.load %arg2[%c0, %c0_0] : memref<40x72xf32, #tpu.memory_space<vmem>>, vector<8x72xf32>
    %c0_1 = arith.constant 0 : index
    %c0_2 = arith.constant 0 : index
    %c0_3 = arith.constant 0 : index
    %1 = vector.load %arg1[%c0_1, %c0_2, %c0_3] : memref<1x72x256xf32, #tpu.memory_space<vmem>>, vector<1x72x256xf32>
    %2 = vector.shape_cast %1 : vector<1x72x256xf32> to vector<72x256xf32>
    %cst = arith.constant dense<0.000000e+00> : vector<8x256xf32>
    %3 = tpu.matmul %0, %2, %cst {dimension_numbers = #tpu.dot_dimension_numbers<[1], [0], [0], [1], [0, 0, 1, 1], [], []>} : vector<8x72xf32>, vector<72x256xf32>, vector<8x256xf32> -> vector<8x256xf32>
    %cst_4 = arith.constant 0.000000e+00 : f32
    %4 = vector.broadcast %cst_4 : f32 to vector<8x256xf32>
    %5 = arith.maximumf %3, %4 : vector<8x256xf32>
    %c17_i32 = arith.constant 17 : i32
    %6 = tpu.dynamic_rotate %5 by %c17_i32 dim 1 : vector<8x256xf32>, i32 -> vector<8x256xf32>
    %c16 = arith.constant 16 : index
    %c0_5 = arith.constant 0 : index
    %7 = vector.load %arg3[%c16, %c0_5] : memref<25x256xf32, #tpu.memory_space<vmem>>, vector<1x256xf32>
    %8 = vector.broadcast %7 : vector<1x256xf32> to vector<8x256xf32>
    %9 = arith.mulf %6, %8 : vector<8x256xf32>
    %c16_i32 = arith.constant 16 : i32
    %10 = tpu.dynamic_rotate %5 by %c16_i32 dim 1 : vector<8x256xf32>, i32 -> vector<8x256xf32>
    %c17 = arith.constant 17 : index
    %c0_6 = arith.constant 0 : index
    %11 = vector.load %arg3[%c17, %c0_6] : memref<25x256xf32, #tpu.memory_space<vmem>>, vector<1x256xf32>
    %12 = vector.broadcast %11 : vector<1x256xf32> to vector<8x256xf32>
    %13 = arith.mulf %10, %12 : vector<8x256xf32>
    %c15_i32 = arith.constant 15 : i32
    %14 = tpu.dynamic_rotate %5 by %c15_i32 dim 1 : vector<8x256xf32>, i32 -> vector<8x256xf32>
    %c18 = arith.constant 18 : index
    %c0_7 = arith.constant 0 : index
    %15 = vector.load %arg3[%c18, %c0_7] : memref<25x256xf32, #tpu.memory_space<vmem>>, vector<1x256xf32>
    %16 = vector.broadcast %15 : vector<1x256xf32> to vector<8x256xf32>
    %17 = arith.mulf %14, %16 : vector<8x256xf32>
    %c1_i32 = arith.constant 1 : i32
    %18 = tpu.dynamic_rotate %5 by %c1_i32 dim 1 : vector<8x256xf32>, i32 -> vector<8x256xf32>
    %c19 = arith.constant 19 : index
    %c0_8 = arith.constant 0 : index
    %19 = vector.load %arg3[%c19, %c0_8] : memref<25x256xf32, #tpu.memory_space<vmem>>, vector<1x256xf32>
    %20 = vector.broadcast %19 : vector<1x256xf32> to vector<8x256xf32>
    %21 = arith.mulf %18, %20 : vector<8x256xf32>
    %c255_i32 = arith.constant 255 : i32
    %22 = tpu.dynamic_rotate %5 by %c255_i32 dim 1 : vector<8x256xf32>, i32 -> vector<8x256xf32>
    %c21 = arith.constant 21 : index
    %c0_9 = arith.constant 0 : index
    %23 = vector.load %arg3[%c21, %c0_9] : memref<25x256xf32, #tpu.memory_space<vmem>>, vector<1x256xf32>
    %24 = vector.broadcast %23 : vector<1x256xf32> to vector<8x256xf32>
    %25 = arith.mulf %22, %24 : vector<8x256xf32>
    %c241_i32 = arith.constant 241 : i32
    %26 = tpu.dynamic_rotate %5 by %c241_i32 dim 1 : vector<8x256xf32>, i32 -> vector<8x256xf32>
    %c22 = arith.constant 22 : index
    %c0_10 = arith.constant 0 : index
    %27 = vector.load %arg3[%c22, %c0_10] : memref<25x256xf32, #tpu.memory_space<vmem>>, vector<1x256xf32>
    %28 = vector.broadcast %27 : vector<1x256xf32> to vector<8x256xf32>
    %29 = arith.mulf %26, %28 : vector<8x256xf32>
    %c240_i32 = arith.constant 240 : i32
    %30 = tpu.dynamic_rotate %5 by %c240_i32 dim 1 : vector<8x256xf32>, i32 -> vector<8x256xf32>
    %c23 = arith.constant 23 : index
    %c0_11 = arith.constant 0 : index
    %31 = vector.load %arg3[%c23, %c0_11] : memref<25x256xf32, #tpu.memory_space<vmem>>, vector<1x256xf32>
    %32 = vector.broadcast %31 : vector<1x256xf32> to vector<8x256xf32>
    %33 = arith.mulf %30, %32 : vector<8x256xf32>
    %c239_i32 = arith.constant 239 : i32
    %34 = tpu.dynamic_rotate %5 by %c239_i32 dim 1 : vector<8x256xf32>, i32 -> vector<8x256xf32>
    %c24 = arith.constant 24 : index
    %c0_12 = arith.constant 0 : index
    %35 = vector.load %arg3[%c24, %c0_12] : memref<25x256xf32, #tpu.memory_space<vmem>>, vector<1x256xf32>
    %36 = vector.broadcast %35 : vector<1x256xf32> to vector<8x256xf32>
    %37 = arith.mulf %34, %36 : vector<8x256xf32>
    %38 = tpu.concatenate %9, %13, %17, %21, %5, %25, %29, %33, %37 in 0 : vector<8x256xf32>, vector<8x256xf32>, vector<8x256xf32>, vector<8x256xf32>, vector<8x256xf32>, vector<8x256xf32>, vector<8x256xf32>, vector<8x256xf32>, vector<8x256xf32> -> vector<72x256xf32>
    %c8 = arith.constant 8 : index
    %c0_13 = arith.constant 0 : index
    %39 = vector.load %arg2[%c8, %c0_13] : memref<40x72xf32, #tpu.memory_space<vmem>>, vector<16x72xf32>
    %cst_14 = arith.constant dense<0.000000e+00> : vector<16x256xf32>
    %40 = tpu.matmul %39, %38, %cst_14 {dimension_numbers = #tpu.dot_dimension_numbers<[1], [0], [0], [1], [0, 0, 1, 1], [], []>} : vector<16x72xf32>, vector<72x256xf32>, vector<16x256xf32> -> vector<16x256xf32>
    %41 = vector.extract_strided_slice %40 {offsets = [0, 0], sizes = [8, 256], strides = [1, 1]} : vector<16x256xf32> to vector<8x256xf32>
    %c8_15 = arith.constant 8 : index
    %c0_16 = arith.constant 0 : index
    %42 = vector.load %arg3[%c8_15, %c0_16] : memref<25x256xf32, #tpu.memory_space<vmem>>, vector<8x256xf32>
    %43 = arith.addf %41, %42 : vector<8x256xf32>
    %cst_17 = arith.constant 0.000000e+00 : f32
    %44 = vector.broadcast %cst_17 : f32 to vector<8x256xf32>
    %45 = arith.maximumf %43, %44 : vector<8x256xf32>
    %46 = vector.extract_strided_slice %40 {offsets = [8, 0], sizes = [8, 256], strides = [1, 1]} : vector<16x256xf32> to vector<8x256xf32>
    %cst_18 = arith.constant 9.99999974E-6 : f32
    %47 = vector.broadcast %cst_18 : f32 to vector<8x256xf32>
    %48 = arith.addf %46, %47 : vector<8x256xf32>
    %cst_19 = arith.constant dense<0xFF800000> : vector<8xf32>
    %49 = vector.multi_reduction <maximumf>, %45, %cst_19 [1] : vector<8x256xf32> to vector<8xf32>
    %50 = vector.shape_cast %49 : vector<8xf32> to vector<8x1xf32>
    %cst_20 = arith.constant dense<0xFF800000> : vector<1xf32>
    %51 = vector.multi_reduction <maximumf>, %50, %cst_20 [0] : vector<8x1xf32> to vector<1xf32>
    %52 = vector.shape_cast %51 : vector<1xf32> to vector<1x1xf32>
    %53 = vector.broadcast %52 : vector<1x1xf32> to vector<8x256xf32>
    %54 = arith.subf %45, %53 : vector<8x256xf32>
    %55 = math.exp %54 : vector<8x256xf32>
    %c0_21 = arith.constant 0 : index
    %c0_22 = arith.constant 0 : index
    %56 = vector.load %arg4[%c0_21, %c0_22] : memref<256x256xf32, #tpu.memory_space<vmem>>, vector<256x256xf32>
    %cst_23 = arith.constant dense<0.000000e+00> : vector<8x256xf32>
    %57 = tpu.matmul %55, %56, %cst_23 {dimension_numbers = #tpu.dot_dimension_numbers<[1], [0], [0], [1], [0, 0, 1, 1], [], []>} : vector<8x256xf32>, vector<256x256xf32>, vector<8x256xf32> -> vector<8x256xf32>
    %58 = arith.divf %55, %57 : vector<8x256xf32>
    %59 = arith.divf %58, %48 : vector<8x256xf32>
    %c24_24 = arith.constant 24 : index
    %c0_25 = arith.constant 0 : index
    %60 = vector.load %arg2[%c24_24, %c0_25] : memref<40x72xf32, #tpu.memory_space<vmem>>, vector<8x72xf32>
    %c17_i32_26 = arith.constant 17 : i32
    %61 = tpu.dynamic_rotate %59 by %c17_i32_26 dim 1 : vector<8x256xf32>, i32 -> vector<8x256xf32>
    %c16_27 = arith.constant 16 : index
    %c0_28 = arith.constant 0 : index
    %62 = vector.load %arg3[%c16_27, %c0_28] : memref<25x256xf32, #tpu.memory_space<vmem>>, vector<1x256xf32>
    %63 = vector.broadcast %62 : vector<1x256xf32> to vector<8x256xf32>
    %64 = arith.mulf %61, %63 : vector<8x256xf32>
    %c16_i32_29 = arith.constant 16 : i32
    %65 = tpu.dynamic_rotate %59 by %c16_i32_29 dim 1 : vector<8x256xf32>, i32 -> vector<8x256xf32>
    %c17_30 = arith.constant 17 : index
    %c0_31 = arith.constant 0 : index
    %66 = vector.load %arg3[%c17_30, %c0_31] : memref<25x256xf32, #tpu.memory_space<vmem>>, vector<1x256xf32>
    %67 = vector.broadcast %66 : vector<1x256xf32> to vector<8x256xf32>
    %68 = arith.mulf %65, %67 : vector<8x256xf32>
    %c15_i32_32 = arith.constant 15 : i32
    %69 = tpu.dynamic_rotate %59 by %c15_i32_32 dim 1 : vector<8x256xf32>, i32 -> vector<8x256xf32>
    %c18_33 = arith.constant 18 : index
    %c0_34 = arith.constant 0 : index
    %70 = vector.load %arg3[%c18_33, %c0_34] : memref<25x256xf32, #tpu.memory_space<vmem>>, vector<1x256xf32>
    %71 = vector.broadcast %70 : vector<1x256xf32> to vector<8x256xf32>
    %72 = arith.mulf %69, %71 : vector<8x256xf32>
    %c1_i32_35 = arith.constant 1 : i32
    %73 = tpu.dynamic_rotate %59 by %c1_i32_35 dim 1 : vector<8x256xf32>, i32 -> vector<8x256xf32>
    %c19_36 = arith.constant 19 : index
    %c0_37 = arith.constant 0 : index
    %74 = vector.load %arg3[%c19_36, %c0_37] : memref<25x256xf32, #tpu.memory_space<vmem>>, vector<1x256xf32>
    %75 = vector.broadcast %74 : vector<1x256xf32> to vector<8x256xf32>
    %76 = arith.mulf %73, %75 : vector<8x256xf32>
    %c255_i32_38 = arith.constant 255 : i32
    %77 = tpu.dynamic_rotate %59 by %c255_i32_38 dim 1 : vector<8x256xf32>, i32 -> vector<8x256xf32>
    %c21_39 = arith.constant 21 : index
    %c0_40 = arith.constant 0 : index
    %78 = vector.load %arg3[%c21_39, %c0_40] : memref<25x256xf32, #tpu.memory_space<vmem>>, vector<1x256xf32>
    %79 = vector.broadcast %78 : vector<1x256xf32> to vector<8x256xf32>
    %80 = arith.mulf %77, %79 : vector<8x256xf32>
    %c241_i32_41 = arith.constant 241 : i32
    %81 = tpu.dynamic_rotate %59 by %c241_i32_41 dim 1 : vector<8x256xf32>, i32 -> vector<8x256xf32>
    %c22_42 = arith.constant 22 : index
    %c0_43 = arith.constant 0 : index
    %82 = vector.load %arg3[%c22_42, %c0_43] : memref<25x256xf32, #tpu.memory_space<vmem>>, vector<1x256xf32>
    %83 = vector.broadcast %82 : vector<1x256xf32> to vector<8x256xf32>
    %84 = arith.mulf %81, %83 : vector<8x256xf32>
    %c240_i32_44 = arith.constant 240 : i32
    %85 = tpu.dynamic_rotate %59 by %c240_i32_44 dim 1 : vector<8x256xf32>, i32 -> vector<8x256xf32>
    %c23_45 = arith.constant 23 : index
    %c0_46 = arith.constant 0 : index
    %86 = vector.load %arg3[%c23_45, %c0_46] : memref<25x256xf32, #tpu.memory_space<vmem>>, vector<1x256xf32>
    %87 = vector.broadcast %86 : vector<1x256xf32> to vector<8x256xf32>
    %88 = arith.mulf %85, %87 : vector<8x256xf32>
    %c239_i32_47 = arith.constant 239 : i32
    %89 = tpu.dynamic_rotate %59 by %c239_i32_47 dim 1 : vector<8x256xf32>, i32 -> vector<8x256xf32>
    %c24_48 = arith.constant 24 : index
    %c0_49 = arith.constant 0 : index
    %90 = vector.load %arg3[%c24_48, %c0_49] : memref<25x256xf32, #tpu.memory_space<vmem>>, vector<1x256xf32>
    %91 = vector.broadcast %90 : vector<1x256xf32> to vector<8x256xf32>
    %92 = arith.mulf %89, %91 : vector<8x256xf32>
    %93 = tpu.concatenate %64, %68, %72, %76, %59, %80, %84, %88, %92 in 0 : vector<8x256xf32>, vector<8x256xf32>, vector<8x256xf32>, vector<8x256xf32>, vector<8x256xf32>, vector<8x256xf32>, vector<8x256xf32>, vector<8x256xf32>, vector<8x256xf32> -> vector<72x256xf32>
    %cst_50 = arith.constant dense<0.000000e+00> : vector<8x256xf32>
    %94 = tpu.matmul %60, %93, %cst_50 {dimension_numbers = #tpu.dot_dimension_numbers<[1], [0], [0], [1], [0, 0, 1, 1], [], []>} : vector<8x72xf32>, vector<72x256xf32>, vector<8x256xf32> -> vector<8x256xf32>
    %95 = arith.mulf %5, %94 : vector<8x256xf32>
    %c0_51 = arith.constant 0 : index
    %c0_52 = arith.constant 0 : index
    %96 = vector.load %arg3[%c0_51, %c0_52] : memref<25x256xf32, #tpu.memory_space<vmem>>, vector<8x256xf32>
    %97 = arith.mulf %95, %96 : vector<8x256xf32>
    %c32 = arith.constant 32 : index
    %c0_53 = arith.constant 0 : index
    %98 = vector.load %arg2[%c32, %c0_53] : memref<40x72xf32, #tpu.memory_space<vmem>>, vector<8x72xf32>
    %c17_i32_54 = arith.constant 17 : i32
    %99 = tpu.dynamic_rotate %97 by %c17_i32_54 dim 1 : vector<8x256xf32>, i32 -> vector<8x256xf32>
    %c16_55 = arith.constant 16 : index
    %c0_56 = arith.constant 0 : index
    %100 = vector.load %arg3[%c16_55, %c0_56] : memref<25x256xf32, #tpu.memory_space<vmem>>, vector<1x256xf32>
    %101 = vector.broadcast %100 : vector<1x256xf32> to vector<8x256xf32>
    %102 = arith.mulf %99, %101 : vector<8x256xf32>
    %c16_i32_57 = arith.constant 16 : i32
    %103 = tpu.dynamic_rotate %97 by %c16_i32_57 dim 1 : vector<8x256xf32>, i32 -> vector<8x256xf32>
    %c17_58 = arith.constant 17 : index
    %c0_59 = arith.constant 0 : index
    %104 = vector.load %arg3[%c17_58, %c0_59] : memref<25x256xf32, #tpu.memory_space<vmem>>, vector<1x256xf32>
    %105 = vector.broadcast %104 : vector<1x256xf32> to vector<8x256xf32>
    %106 = arith.mulf %103, %105 : vector<8x256xf32>
    %c15_i32_60 = arith.constant 15 : i32
    %107 = tpu.dynamic_rotate %97 by %c15_i32_60 dim 1 : vector<8x256xf32>, i32 -> vector<8x256xf32>
    %c18_61 = arith.constant 18 : index
    %c0_62 = arith.constant 0 : index
    %108 = vector.load %arg3[%c18_61, %c0_62] : memref<25x256xf32, #tpu.memory_space<vmem>>, vector<1x256xf32>
    %109 = vector.broadcast %108 : vector<1x256xf32> to vector<8x256xf32>
    %110 = arith.mulf %107, %109 : vector<8x256xf32>
    %c1_i32_63 = arith.constant 1 : i32
    %111 = tpu.dynamic_rotate %97 by %c1_i32_63 dim 1 : vector<8x256xf32>, i32 -> vector<8x256xf32>
    %c19_64 = arith.constant 19 : index
    %c0_65 = arith.constant 0 : index
    %112 = vector.load %arg3[%c19_64, %c0_65] : memref<25x256xf32, #tpu.memory_space<vmem>>, vector<1x256xf32>
    %113 = vector.broadcast %112 : vector<1x256xf32> to vector<8x256xf32>
    %114 = arith.mulf %111, %113 : vector<8x256xf32>
    %c255_i32_66 = arith.constant 255 : i32
    %115 = tpu.dynamic_rotate %97 by %c255_i32_66 dim 1 : vector<8x256xf32>, i32 -> vector<8x256xf32>
    %c21_67 = arith.constant 21 : index
    %c0_68 = arith.constant 0 : index
    %116 = vector.load %arg3[%c21_67, %c0_68] : memref<25x256xf32, #tpu.memory_space<vmem>>, vector<1x256xf32>
    %117 = vector.broadcast %116 : vector<1x256xf32> to vector<8x256xf32>
    %118 = arith.mulf %115, %117 : vector<8x256xf32>
    %c241_i32_69 = arith.constant 241 : i32
    %119 = tpu.dynamic_rotate %97 by %c241_i32_69 dim 1 : vector<8x256xf32>, i32 -> vector<8x256xf32>
    %c22_70 = arith.constant 22 : index
    %c0_71 = arith.constant 0 : index
    %120 = vector.load %arg3[%c22_70, %c0_71] : memref<25x256xf32, #tpu.memory_space<vmem>>, vector<1x256xf32>
    %121 = vector.broadcast %120 : vector<1x256xf32> to vector<8x256xf32>
    %122 = arith.mulf %119, %121 : vector<8x256xf32>
    %c240_i32_72 = arith.constant 240 : i32
    %123 = tpu.dynamic_rotate %97 by %c240_i32_72 dim 1 : vector<8x256xf32>, i32 -> vector<8x256xf32>
    %c23_73 = arith.constant 23 : index
    %c0_74 = arith.constant 0 : index
    %124 = vector.load %arg3[%c23_73, %c0_74] : memref<25x256xf32, #tpu.memory_space<vmem>>, vector<1x256xf32>
    %125 = vector.broadcast %124 : vector<1x256xf32> to vector<8x256xf32>
    %126 = arith.mulf %123, %125 : vector<8x256xf32>
    %c239_i32_75 = arith.constant 239 : i32
    %127 = tpu.dynamic_rotate %97 by %c239_i32_75 dim 1 : vector<8x256xf32>, i32 -> vector<8x256xf32>
    %c24_76 = arith.constant 24 : index
    %c0_77 = arith.constant 0 : index
    %128 = vector.load %arg3[%c24_76, %c0_77] : memref<25x256xf32, #tpu.memory_space<vmem>>, vector<1x256xf32>
    %129 = vector.broadcast %128 : vector<1x256xf32> to vector<8x256xf32>
    %130 = arith.mulf %127, %129 : vector<8x256xf32>
    %131 = tpu.concatenate %102, %106, %110, %114, %97, %118, %122, %126, %130 in 0 : vector<8x256xf32>, vector<8x256xf32>, vector<8x256xf32>, vector<8x256xf32>, vector<8x256xf32>, vector<8x256xf32>, vector<8x256xf32>, vector<8x256xf32>, vector<8x256xf32> -> vector<72x256xf32>
    %cst_78 = arith.constant dense<0.000000e+00> : vector<8x256xf32>
    %132 = tpu.matmul %98, %131, %cst_78 {dimension_numbers = #tpu.dot_dimension_numbers<[1], [0], [0], [1], [0, 0, 1, 1], [], []>} : vector<8x72xf32>, vector<72x256xf32>, vector<8x256xf32> -> vector<8x256xf32>
    %cst_79 = arith.constant dense<0.000000e+00> : vector<256xf32>
    %133 = vector.multi_reduction <add>, %132, %cst_79 [0] : vector<8x256xf32> to vector<256xf32>
    %c0_80 = arith.constant 0 : index
    %c0_81 = arith.constant 0 : index
    %c0_82 = arith.constant 0 : index
    %134 = vector.load %arg5[%c0_80, %c0_81, %c0_82] : memref<1x1x256xf32, #tpu.memory_space<vmem>>, vector<1x1x256xf32>
    %135 = vector.shape_cast %134 : vector<1x1x256xf32> to vector<256xf32>
    %136 = vector.shape_cast %133 : vector<256xf32> to vector<1x1x256xf32>
    tpu.vector_store %arg5[%c0_80, %c0_81, %c0_82], %136 {strides = array<i32>} : memref<1x1x256xf32, #tpu.memory_space<vmem>>, vector<1x1x256xf32>,
    return
  }
  func.func @transform_0(%arg0: i32) -> (i32, i32, i32) {
    %c0_i32 = arith.constant 0 : i32
    %c0_i32_0 = arith.constant 0 : i32
    %c0_i32_1 = arith.constant 0 : i32
    return %arg0, %c0_i32, %c0_i32_0 : i32, i32, i32
  }
  func.func @transform_1(%arg0: i32) -> (i32, i32) {
    %c0_i32 = arith.constant 0 : i32
    %c0_i32_0 = arith.constant 0 : i32
    %c0_i32_1 = arith.constant 0 : i32
    return %c0_i32, %c0_i32_0 : i32, i32
  }
  func.func @transform_2(%arg0: i32) -> (i32, i32) {
    %c0_i32 = arith.constant 0 : i32
    %c0_i32_0 = arith.constant 0 : i32
    %c0_i32_1 = arith.constant 0 : i32
    return %c0_i32, %c0_i32_0 : i32, i32
  }
  func.func @transform_3(%arg0: i32) -> (i32, i32) {
    %c0_i32 = arith.constant 0 : i32
    %c0_i32_0 = arith.constant 0 : i32
    %c0_i32_1 = arith.constant 0 : i32
    return %c0_i32, %c0_i32_0 : i32, i32
  }
  func.func @transform_4(%arg0: i32) -> (i32, i32, i32) {
    %c0_i32 = arith.constant 0 : i32
    %c0_i32_0 = arith.constant 0 : i32
    %c0_i32_1 = arith.constant 0 : i32
    return %arg0, %c0_i32, %c0_i32_0 : i32, i32, i32
  }
}

</mosaic_0001>

<bundles_post_ra>
// kernel: _lambda_.1
= control target key start
LH: loop header
LB: loop body
LE: loop exit
PB: predicated region body
PF: predicated region fallthrough
CT: control target
= control target key end

     0   :  { %s1317_s15 = smov 0   ;;  %s1933_s0 = inlined_call_operand.vmem [shape: f32[2,72,256], index: 0, kind: input, shape index: {}]   ;;  %s1934_s1 = inlined_call_operand.vmem [shape: f32[40,72], index: 1, kind: input, shape index: {}]   ;;  %s1935_s2 = inlined_call_operand.vmem [shape: f32[25,256], index: 2, kind: input, shape index: {}]   ;;  %s1936_s3 = inlined_call_operand.vmem [shape: f32[256,256], index: 3, kind: input, shape index: {}]   ;;  %s1937_s4 = inlined_call_operand.vmem [shape: f32[2,1,256], index: 4, kind: output, shape index: {}]  }
   0x1 LB: > { %s1093_s16 = sadd.s32 4294967295, %s1280_s15   ;;  %p1097_p0 = scmp.ge.s32.totalorder %s1280_s15, 1  ;;  %s1280_s15 = sphi %s1317_s15, %s14_s15  }
   0x2   : > { %p162_p1 = scmp.lt.s32.totalorder %s1280_s15, 3 }
   0x4   : > { %p163_p2 = pnand %p1097_p0, %p162_p1 }
   0x5   : > { %p187_p3 = scmp.lt.s32.totalorder (!%p163_p2), %s1093_s16, 1  ;;  %v1282_v0 = vmov (!%p163_p2), 0.0   ;;  %v196_v27 = vld [vmem:[%s1934_s1] sm:$0xff] (!%p163_p2)  ;;  %vm215_vm0 = vcmask (!%p163_p2), 588800   ;;  %s1283_s23 = smov (!%p163_p2), 16   ;;  %v296_v32 = vlaneseq (!%p163_p2) }
   0x6   : > { %166 = sbr.rel (%p163_p2) target bundleno = 1792 (0x700), region = 36  ;;  %283 = vmatprep.mubr.f32.mxu1 (!%p163_p2), %v1282_v0  ;;  %s1284_s24 = smov (!%p163_p2), 17   ;;  %v1102_v41 = vld [vmem:[%s1935_s2 + $0x21] ss:$8 sm:$0x3] (!%p163_p2) }
   0x7   : > { %s1285_s25 = smov (!%p163_p2), 15   ;;  %s1286_s26 = smov (!%p163_p2), 1   ;;  %v1394_v35 = vshrl.u32 (!%p163_p2), %v296_v32, 7  ;;  %v1397_v36 = vand.u32 (!%p163_p2), 127, %v296_v32  ;;  %vm1037_vm9 = vcmp.lt.s32.totalorder (!%p163_p2), %v296_v32, 256 }
   0x8   : > { %s1287_s27 = smov (!%p163_p2), 127   ;;  %s1288_s28 = smov (!%p163_p2), 113   ;;  %v1104_v42 = vld [vmem:[%s1935_s2 + $0x23] ss:$8 sm:$0x3] (!%p163_p2) }
   0x9   : > { %s1289_s29 = smov (!%p163_p2), 112   ;;  %s1290_s30 = smov (!%p163_p2), 111   ;;  %v1400_v38 = vsub.s32 (!%p163_p2), 0, %v1394_v35  ;;  %v1403_v39 = vsub.s32 (!%p163_p2), 1, %v1394_v35  ;;  %vm320_vm1 = vcmp.lt.s32.totalorder (!%p163_p2), %v1397_v36, 16  ;;  %vm342_vm2 = vcmp.lt.s32.totalorder (!%p163_p2), %v1397_v36, 15 }
   0xa   : > { %v1101_v43 = vld [vmem:[%s1935_s2 + $0x20] ss:$8 sm:$0x3] (!%p163_p2)  ;;  %v1103_v47 = vld [vmem:[%s1935_s2 + $0x22] ss:$8 sm:$0x3] (!%p163_p2) }
   0xb   : > { %v1416_v44 = vrot.slane (!%p163_p2), %v1102_v41, %v1400_v38  ;;  %v1419_v45 = vrot.slane (!%p163_p2), %v1102_v41, %v1403_v39  ;;  %vm364_vm3 = vcmp.lt.s32.totalorder (!%p163_p2), %v1397_v36, 1  ;;  %v1105_v51 = vld [vmem:[%s1935_s2 + $0x25] ss:$8 sm:$0x3] (!%p163_p2)  ;;  %v1434_v52 = vrot.slane (!%p163_p2), %v1104_v42, %v1403_v39 }
   0xc   : > { %vm298_vm4 = vcmp.lt.s32.totalorder (!%p163_p2), %v1397_v36, 17  ;;  %v1438_v53 = vrot.slane (!%p163_p2), %v1101_v43, %v1400_v38  ;;  %v1441_v54 = vrot.slane (!%p163_p2), %v1101_v43, %v1403_v39  ;;  %v1444_v55 = vrot.slane (!%p163_p2), %v1103_v47, %v1403_v39 }
   0xd   : > { %s1939_s16 = smov (!%p187_p3, %s1093_s16), 1  ;;  %v1447_v56 = vrot.slane %v1104_v42, %v1400_v38  ;;  %vm386_vm5 = vcmp.lt.s32.totalorder %v1397_v36, 127  ;;  %v1453_v61 = vrot.slane %v1105_v51, %v1403_v39  ;;  %vm408_vm6 = vcmp.lt.s32.totalorder %v1397_v36, 113 }
   0xe   : > { %s1243_s17 = smul.u32 144, %s1939_s16  ;;  %vm430_vm7 = vcmp.lt.s32.totalorder %v1397_v36, 112  ;;  %vm452_vm8 = vcmp.lt.s32.totalorder %v1397_v36, 111 }
  0x10   : > { %s1332_s20 = scalar_lea.vmem %s1933_s0, %s1243_s17 }
  0x11   : > { %v198_v1 = vld [vmem:[%s1332_s20 + $0x8] sm:$0xff]  ;;  %v200_v2 = vld [vmem:[%s1332_s20 + $0x18] sm:$0xff]  ;;  %v197_v3 = vld [vmem:[%s1332_s20] sm:$0xff] }
  0x12   : > { %v1115_v4 = vpack.c.bf16 %v200_v2, %v198_v1  ;;  %v199_v5 = vld [vmem:[%s1332_s20 + $0x10] sm:$0xff]  ;;  %v202_v6 = vld [vmem:[%s1332_s20 + $0x28] sm:$0xff]  ;;  %v204_v7 = vld [vmem:[%s1332_s20 + $0x38] sm:$0xff] }
  0x13   : > { %v1117_v8 = vpack.c.bf16 %v199_v5, %v197_v3  ;;  %v1119_v9 = vpack.c.bf16 %v204_v7, %v202_v6  ;;  %v201_v10 = vld [vmem:[%s1332_s20 + $0x20] sm:$0xff]  ;;  %v203_v11 = vld [vmem:[%s1332_s20 + $0x30] sm:$0xff]  ;;  %v206_v12 = vld [vmem:[%s1332_s20 + $0x48] sm:$0xff]  ;;  %v1469_v7 = vrot.slane %v1103_v47, %v1400_v38 }
  0x14   : > { %1116 = vmatprep.subr.bf16.mxu1 %v1115_v4  ;;  %v208_v13 = vld [vmem:[%s1332_s20 + $0x58] sm:$0xff]  ;;  %v1121_v14 = vpack.c.bf16 %v203_v11, %v201_v10  ;;  %v205_v16 = vld [vmem:[%s1332_s20 + $0x40] sm:$0xff]  ;;  %v207_v17 = vld [vmem:[%s1332_s20 + $0x50] sm:$0xff] }
  0x15   : > { %1118 = vmatpush1.bf16.msra.mxu1 %v1117_v8  ;;  %v1123_v15 = vpack.c.bf16 %v208_v13, %v206_v12  ;;  %v210_v18 = vld [vmem:[%s1332_s20 + $0x68] sm:$0xff]  ;;  %v212_v19 = vld [vmem:[%s1332_s20 + $0x78] sm:$0xff]  ;;  %v1125_v20 = vpack.c.bf16 %v207_v17, %v205_v16  ;;  %v209_v22 = vld [vmem:[%s1332_s20 + $0x60] sm:$0xff] }
  0x16   : > { %1120 = vmatprep.subr.bf16.mxu1 %v1119_v9  ;;  %v1127_v21 = vpack.c.bf16 %v212_v19, %v210_v18  ;;  %v211_v23 = vld [vmem:[%s1332_s20 + $0x70] sm:$0xff]  ;;  %v214_v25 = vld [vmem:[%s1332_s20 + $0x88] sm:$0xff]  ;;  %v213_v26 = vld [vmem:[%s1332_s20 + $0x80] sm:$0xff] }
  0x17   : > { %v1129_v24 = vpack.c.bf16 %v211_v23, %v209_v22  ;;  %v1107_v22 = vld [vmem:[%s1935_s2 + $0x27] ss:$8 sm:$0x3] }
  0x19   : > { %1122 = vmatpush1.bf16.msra.mxu1 %v1121_v14 }
  0x1a   : > { %1124 = vmatprep.subr.bf16.mxu1 %v1123_v15  ;;  %v1476_v15 = vrot.slane %v1105_v51, %v1400_v38 }
  0x1d   : > { %1126 = vmatpush1.bf16.msra.mxu1 %v1125_v20  ;;  %v1106_v20 = vld [vmem:[%s1935_s2 + $0x26] ss:$8 sm:$0x3] }
  0x1e   : > { %1128 = vmatprep.subr.bf16.mxu1 %v1127_v21 }
  0x21   : > { %1130 = vmatpush1.bf16.msra.mxu1 %v1129_v24 }
  0x22   : > { %235 = vmatprep.subr.mxu1 %v214_v25 }
  0x25   : > { %236 = vmatpush1.msra.mxu1 %v213_v26 }
  0x26   : > { %1100 = vmatmul.mubr.msk.f32.vlgmr.msra.gmra.mrb[0].mxu1 %vm215_vm0, %v196_v27  ;;  %v1493_v27 = vrot.slane %v1106_v20, %v1400_v38 }
  0x27   : > { %542 = vmatprep.mubr.f32.mxu1 %v1282_v0 }
  0xf9   : > { %v285_v28 = vpop.f32.mrb[0].mxu1 }
  0xfa   : > { %v1357_v29 = vmax.f32 %v285_v28, 0.0  ;;  %v287_v30 = vpop.f32.mrb[1].mxu1  ;;  %v1496_v28 = vrot.slane %v1106_v20, %v1403_v39 }
  0xfb   : > { %v1363_v31 = vmax.f32 %v287_v30, 0.0 }
  0xfc   : > { %316 = vrot.lane.b32.xlu1 %v1357_v29, %s1283_s23  ;;  %292 = vrot.lane.b32.xlu0 %v1357_v29, %s1284_s24 }
 0x100   : > { %338 = vrot.lane.b32.xlu0 %v1357_v29, %s1285_s25  ;;  %318 = vrot.lane.b32.xlu1 %v1363_v31, %s1283_s23 }
 0x104   : > { %360 = vrot.lane.b32.xlu0 %v1357_v29, %s1286_s26  ;;  %340 = vrot.lane.b32.xlu1 %v1363_v31, %s1285_s25 }
 0x108   : > { %362 = vrot.lane.b32.xlu1 %v1363_v31, %s1286_s26  ;;  %294 = vrot.lane.b32.xlu0 %v1363_v31, %s1284_s24 }
 0x10c   : > { %384 = vrot.lane.b32.xlu1 %v1363_v31, %s1287_s27  ;;  %382 = vrot.lane.b32.xlu0 %v1357_v29, %s1287_s27 }
 0x110   : > { %406 = vrot.lane.b32.xlu1 %v1363_v31, %s1288_s28  ;;  %404 = vrot.lane.b32.xlu0 %v1357_v29, %s1288_s28 }
 0x114   : > { %428 = vrot.lane.b32.xlu1 %v1363_v31, %s1289_s29  ;;  %426 = vrot.lane.b32.xlu0 %v1357_v29, %s1289_s29 }
 0x118   : > { %450 = vrot.lane.b32.xlu1 %v1363_v31, %s1290_s30  ;;  %448 = vrot.lane.b32.xlu0 %v1357_v29, %s1290_s30 }
 0x16e   : > { %v317_v33 = vpop.permute.xlu1 %316  ;;  %v293_v34 = vpop.permute.xlu0 %292 }
 0x172   : > { %v339_v37 = vpop.permute.xlu0 %338  ;;  %v319_v40 = vpop.permute.xlu1 %318 }
 0x173   : > { %v321_v49 = vsel %vm320_vm1, %v317_v33, %v319_v40  ;;  %v322_v50 = vsel %vm320_vm1, %v319_v40, %v317_v33  ;;  %v1501_v33 = vrot.slane %v1107_v22, %v1400_v38 }
 0x174   : > { %v336_v57 = vmul.f32 %v1416_v44, %v322_v50  ;;  %v337_v58 = vmul.f32 %v1419_v45, %v321_v49 }
 0x176   : > { %v361_v46 = vpop.permute.xlu0 %360  ;;  %v341_v48 = vpop.permute.xlu1 %340 }
 0x177   : > { %v343_v62 = vsel %vm342_vm2, %v339_v37, %v341_v48  ;;  %v344_v8 = vsel %vm342_vm2, %v341_v48, %v339_v37  ;;  %v1108_v37 = vld [vmem:[%s1935_s2 + $0x30] ss:$8 sm:$0x3] }
 0x178   : > { %v359_v9 = vmul.f32 %v1444_v55, %v343_v62  ;;  %v358_v21 = vmul.f32 %v1469_v7, %v344_v8  ;;  %v1520_v49 = vrot.slane %v1108_v37, %v1403_v39  ;;  %v578_v8 = vld [vmem:[%s1936_s3] sm:$0xff] }
 0x17a   : > { %v363_v59 = vpop.permute.xlu1 %362  ;;  %v295_v60 = vpop.permute.xlu0 %294 }
 0x17b   : > { %v365_v63 = vsel %vm364_vm3, %v361_v46, %v363_v59  ;;  %v299_v1 = vsel %vm298_vm4, %v293_v34, %v295_v60  ;;  %v300_v2 = vsel %vm298_vm4, %v295_v60, %v293_v34  ;;  %v366_v3 = vsel %vm364_vm3, %v363_v59, %v361_v46 }
 0x17c   : > { %v381_v4 = vmul.f32 %v1434_v52, %v365_v63  ;;  %v314_v5 = vmul.f32 %v1438_v53, %v300_v2  ;;  %v315_v6 = vmul.f32 %v1441_v54, %v299_v1  ;;  %v380_v14 = vmul.f32 %v1447_v56, %v366_v3 }
 0x17d   : > { %v1504_v34 = vrot.slane %v1107_v22, %v1403_v39  ;;  %v1527_v1 = vrot.slane %v1108_v37, %v1400_v38  ;;  %v579_v38 = vld [vmem:[%s1936_s3 + $0x8] sm:$0xff]  ;;  %v586_v22 = vld [vmem:[%s1936_s3 + $0x40] sm:$0xff] }
 0x17e   : > { %v1133_v10 = vpack.c.bf16 %v336_v57, %v314_v5  ;;  %v385_v11 = vpop.permute.xlu1 %384  ;;  %v383_v12 = vpop.permute.xlu0 %382  ;;  %v1131_v13 = vpack.c.bf16 %v337_v58, %v315_v6  ;;  %v1135_v19 = vpack.c.bf16 %v381_v4, %v359_v9  ;;  %v1137_v25 = vpack.c.bf16 %v380_v14, %v358_v21  ;;  %v470_v5 = vld [vmem:[%s1934_s1 + $0x8] sm:$0xff]  ;;  %v581_v6 = vld [vmem:[%s1936_s3 + $0x18] sm:$0xff]  ;;  %v590_v37 = vld [vmem:[%s1936_s3 + $0x60] sm:$0xff] }
 0x17f   : > { %v388_v16 = vsel %vm386_vm5, %v385_v11, %v383_v12  ;;  %v387_v17 = vsel %vm386_vm5, %v383_v12, %v385_v11  ;;  %v1147_v9 = vpack.c.bf16 %v581_v6, %v579_v38  ;;  %v583_v11 = vld [vmem:[%s1936_s3 + $0x28] sm:$0xff]  ;;  %v585_v12 = vld [vmem:[%s1936_s3 + $0x38] sm:$0xff] }
 0x180   : > { %v403_v18 = vmul.f32 %v1453_v61, %v388_v16  ;;  %1132 = vmatprep.subr.bf16.mxu1 %v1131_v13  ;;  %v402_v26 = vmul.f32 %v1476_v15, %v387_v17  ;;  %v1151_v14 = vpack.c.bf16 %v585_v12, %v583_v11  ;;  %v582_v16 = vld [vmem:[%s1936_s3 + $0x20] sm:$0xff]  ;;  %v584_v17 = vld [vmem:[%s1936_s3 + $0x30] sm:$0xff]  ;;  %v609_v38 = vld [vmem:[%s1936_s3 + $0xf8] sm:$0xff] }
 0x181   : > { %1134 = vmatpush1.bf16.msra.mxu1 %v1133_v10  ;;  %v580_v10 = vld [vmem:[%s1936_s3 + $0x10] sm:$0xff]  ;;  %1148 = vmatprep.subr.bf16.mxu0 %v1147_v9  ;;  %v1153_v20 = vpack.c.bf16 %v584_v17, %v582_v16  ;;  %v606_v9 = vld [vmem:[%s1936_s3 + $0xe0] sm:$0xff]  ;;  %v611_v11 = vld [vmem:[%s1936_s3 + $0x108] sm:$0xff] }
 0x182   : > { %v407_v23 = vpop.permute.xlu1 %406  ;;  %1136 = vmatprep.subr.bf16.mxu1 %v1135_v19  ;;  %v405_v24 = vpop.permute.xlu0 %404  ;;  %v1139_v30 = vpack.c.bf16 %v403_v18, %v1363_v31  ;;  %v1141_v46 = vpack.c.bf16 %v402_v26, %v1357_v29  ;;  %v1149_v13 = vpack.c.bf16 %v580_v10, %v578_v8  ;;  %v587_v18 = vld [vmem:[%s1936_s3 + $0x48] sm:$0xff]  ;;  %v589_v19 = vld [vmem:[%s1936_s3 + $0x58] sm:$0xff]  ;;  %v608_v10 = vld [vmem:[%s1936_s3 + $0xf0] sm:$0xff] }
 0x183   : > { %v409_v40 = vsel %vm408_vm6, %v405_v24, %v407_v23  ;;  %v410_v41 = vsel %vm408_vm6, %v407_v23, %v405_v24  ;;  %v1155_v21 = vpack.c.bf16 %v589_v19, %v587_v18  ;;  %v588_v23 = vld [vmem:[%s1936_s3 + $0x50] sm:$0xff]  ;;  %v591_v24 = vld [vmem:[%s1936_s3 + $0x68] sm:$0xff]  ;;  %v613_v12 = vld [vmem:[%s1936_s3 + $0x118] sm:$0xff] }
 0x184   : > { %v424_v50 = vmul.f32 %v1493_v27, %v409_v40  ;;  %v425_v51 = vmul.f32 %v1496_v28, %v410_v41  ;;  %1150 = vmatpush1.bf16.msra.mxu0 %v1149_v13  ;;  %v1157_v26 = vpack.c.bf16 %v588_v23, %v586_v22  ;;  %v592_v40 = vld [vmem:[%s1936_s3 + $0x70] sm:$0xff]  ;;  %v595_v41 = vld [vmem:[%s1936_s3 + $0x88] sm:$0xff]  ;;  %v1177_v13 = vpack.c.bf16 %v608_v10, %v606_v9  ;;  %v610_v16 = vld [vmem:[%s1936_s3 + $0x100] sm:$0xff] }
 0x185   : > { %1138 = vmatpush1.bf16.msra.mxu1 %v1137_v25  ;;  %1152 = vmatprep.subr.bf16.mxu0 %v1151_v14  ;;  %v593_v25 = vld [vmem:[%s1936_s3 + $0x78] sm:$0xff]  ;;  %v1179_v14 = vpack.c.bf16 %v613_v12, %v611_v11  ;;  %v612_v17 = vld [vmem:[%s1936_s3 + $0x110] sm:$0xff]  ;;  %v631_v9 = vld [vmem:[%s1936_s3 + $0x1a8] sm:$0xff] }
 0x186   : > { %v429_v42 = vpop.permute.xlu1 %428  ;;  %1140 = vmatprep.subr.bf16.mxu1 %v1139_v30  ;;  %v427_v43 = vpop.permute.xlu0 %426  ;;  %v1159_v30 = vpack.c.bf16 %v593_v25, %v591_v24  ;;  %v1181_v18 = vpack.c.bf16 %v612_v17, %v610_v16  ;;  %v555_v19 = vld [vmem:[%s1935_s2 + $0x10] sm:$0xff]  ;;  %v633_v10 = vld [vmem:[%s1936_s3 + $0x1b8] sm:$0xff]  ;;  %v630_v12 = vld [vmem:[%s1936_s3 + $0x1a0] sm:$0xff] }
 0x187   : > { %v431_v47 = vsel %vm430_vm7, %v427_v43, %v429_v42  ;;  %v432_v48 = vsel %vm430_vm7, %v429_v42, %v427_v43  ;;  %v597_v42 = vld [vmem:[%s1936_s3 + $0x98] sm:$0xff]  ;;  %v1161_v43 = vpack.c.bf16 %v592_v40, %v590_v37  ;;  %v615_v37 = vld [vmem:[%s1936_s3 + $0x128] sm:$0xff]  ;;  %v1199_v11 = vpack.c.bf16 %v633_v10, %v631_v9 }
 0x188   : > { %v446_v57 = vmul.f32 %v1501_v33, %v431_v47  ;;  %v447_v58 = vmul.f32 %v1504_v34, %v432_v48  ;;  %1154 = vmatpush1.bf16.msra.mxu0 %v1153_v20  ;;  %v594_v47 = vld [vmem:[%s1936_s3 + $0x80] sm:$0xff]  ;;  %v596_v48 = vld [vmem:[%s1936_s3 + $0x90] sm:$0xff]  ;;  %v556_v20 = vld [vmem:[%s1935_s2 + $0x18] sm:$0xff] }
 0x189   : > { %1142 = vmatpush1.bf16.msra.mxu1 %v1141_v46  ;;  %1156 = vmatprep.subr.bf16.mxu0 %v1155_v21  ;;  %v1163_v46 = vpack.c.bf16 %v597_v42, %v595_v41  ;;  %v617_v40 = vld [vmem:[%s1936_s3 + $0x138] sm:$0xff]  ;;  %v614_v42 = vld [vmem:[%s1936_s3 + $0x120] sm:$0xff]  ;;  %v635_v16 = vld [vmem:[%s1936_s3 + $0x1c8] sm:$0xff] }
 0x18a   : > { %v1145_v59 = vpack.c.bf16 %v446_v57, %v424_v50  ;;  %v451_v60 = vpop.permute.xlu1 %450  ;;  %v449_v62 = vpop.permute.xlu0 %448  ;;  %v1143_v63 = vpack.c.bf16 %v447_v58, %v425_v51  ;;  %v599_v50 = vld [vmem:[%s1936_s3 + $0xa8] sm:$0xff]  ;;  %v601_v51 = vld [vmem:[%s1936_s3 + $0xb8] sm:$0xff]  ;;  %v1165_v57 = vpack.c.bf16 %v596_v48, %v594_v47  ;;  %v1183_v41 = vpack.c.bf16 %v617_v40, %v615_v37  ;;  %v638_v40 = vld [vmem:[%s1936_s3 + $0x1e0] sm:$0xff] }
 0x18b   : > { %v454_v39 = vsel %vm452_vm8, %v451_v60, %v449_v62  ;;  %v453_v2 = vsel %vm452_vm8, %v449_v62, %v451_v60  ;;  %v1167_v58 = vpack.c.bf16 %v601_v51, %v599_v50  ;;  %v600_v60 = vld [vmem:[%s1936_s3 + $0xb0] sm:$0xff]  ;;  %v603_v62 = vld [vmem:[%s1936_s3 + $0xc8] sm:$0xff]  ;;  %v621_v48 = vld [vmem:[%s1936_s3 + $0x158] sm:$0xff] }
 0x18c   : > { %v469_v3 = vmul.f32 %v1520_v49, %v454_v39  ;;  %1144 = vmatprep.subr.bf16.mxu1 %v1143_v63  ;;  %v468_v4 = vmul.f32 %v1527_v1, %v453_v2  ;;  %1158 = vmatpush1.bf16.msra.mxu0 %v1157_v26  ;;  %v605_v63 = vld [vmem:[%s1936_s3 + $0xd8] sm:$0xff]  ;;  %v619_v47 = vld [vmem:[%s1936_s3 + $0x148] sm:$0xff]  ;;  %v618_v51 = vld [vmem:[%s1936_s3 + $0x140] sm:$0xff] }
 0x18d   : > { %1146 = vmatpush1.bf16.msra.mxu1 %v1145_v59  ;;  %1160 = vmatprep.subr.bf16.mxu0 %v1159_v30  ;;  %v598_v59 = vld [vmem:[%s1936_s3 + $0xa0] sm:$0xff]  ;;  %v1171_v2 = vpack.c.bf16 %v605_v63, %v603_v62  ;;  %v1187_v50 = vpack.c.bf16 %v621_v48, %v619_v47  ;;  %v637_v17 = vld [vmem:[%s1936_s3 + $0x1d8] sm:$0xff] }
 0x18e   : > { %494 = vmatprep.subr.mxu1 %v469_v3  ;;  %v1169_v39 = vpack.c.bf16 %v600_v60, %v598_v59  ;;  %v602_v3 = vld [vmem:[%s1936_s3 + $0xc0] sm:$0xff]  ;;  %v623_v59 = vld [vmem:[%s1936_s3 + $0x168] sm:$0xff]  ;;  %v625_v60 = vld [vmem:[%s1936_s3 + $0x178] sm:$0xff] }
 0x18f   : > { %v1191_v62 = vpack.c.bf16 %v625_v60, %v623_v59  ;;  %v622_v63 = vld [vmem:[%s1936_s3 + $0x160] sm:$0xff] }
 0x190   : > { %1162 = vmatpush1.bf16.msra.mxu0 %v1161_v43  ;;  %v616_v43 = vld [vmem:[%s1936_s3 + $0x130] sm:$0xff] }
 0x191   : > { %495 = vmatpush1.msra.mxu1 %v468_v4  ;;  %1164 = vmatprep.subr.bf16.mxu0 %v1163_v46  ;;  %v604_v4 = vld [vmem:[%s1936_s3 + $0xd0] sm:$0xff]  ;;  %v1185_v46 = vpack.c.bf16 %v616_v43, %v614_v42 }
 0x192   : > { %1109 = vmatmul.mubr.msk.f32.vlgmr.msra.gmra.mrb[2].mxu1 %vm215_vm0, %v470_v5  ;;  %v607_v5 = vld [vmem:[%s1936_s3 + $0xe8] sm:$0xff]  ;;  %v1173_v6 = vpack.c.bf16 %v604_v4, %v602_v3  ;;  %v629_v4 = vld [vmem:[%s1936_s3 + $0x198] sm:$0xff]  ;;  %v471_v42 = vld [vmem:[%s1934_s1 + $0x10] sm:$0xff] }
 0x193   : > { %548 = vmatprep.mubr.f32.mxu1 %v1282_v0  ;;  %v1175_v8 = vpack.c.bf16 %v609_v38, %v607_v5  ;;  %v627_v3 = vld [vmem:[%s1936_s3 + $0x188] sm:$0xff]  ;;  %v626_v38 = vld [vmem:[%s1936_s3 + $0x180] sm:$0xff] }
 0x194   : > { %1166 = vmatpush1.bf16.msra.mxu0 %v1165_v57  ;;  %v620_v57 = vld [vmem:[%s1936_s3 + $0x150] sm:$0xff]  ;;  %v1195_v5 = vpack.c.bf16 %v629_v4, %v627_v3 }
 0x195   : > { %1168 = vmatprep.subr.bf16.mxu0 %v1167_v58  ;;  %v1189_v58 = vpack.c.bf16 %v620_v57, %v618_v51 }
 0x196   : > { %1110 = vmatmul.mubr.msk.f32.gmra.mrb[4].mxu1 %vm215_vm0, %v471_v42 }
 0x197   : > { %853 = vmatprep.mubr.f32.mxu1 %v1282_v0 }
 0x198   : > { %1170 = vmatpush1.bf16.msra.mxu0 %v1169_v39  ;;  %v624_v39 = vld [vmem:[%s1936_s3 + $0x170] sm:$0xff] }
 0x199   : > { %1172 = vmatprep.subr.bf16.mxu0 %v1171_v2  ;;  %v1193_v2 = vpack.c.bf16 %v624_v39, %v622_v63 }
 0x19c   : > { %1174 = vmatpush1.bf16.msra.mxu0 %v1173_v6  ;;  %v628_v6 = vld [vmem:[%s1936_s3 + $0x190] sm:$0xff] }
 0x19d   : > { %1176 = vmatprep.subr.bf16.mxu0 %v1175_v8  ;;  %v1197_v8 = vpack.c.bf16 %v628_v6, %v626_v38 }
 0x1a0   : > { %1178 = vmatpush1.bf16.msra.mxu0 %v1177_v13  ;;  %v632_v13 = vld [vmem:[%s1936_s3 + $0x1b0] sm:$0xff] }
 0x1a1   : > { %1180 = vmatprep.subr.bf16.mxu0 %v1179_v14  ;;  %v1201_v14 = vpack.c.bf16 %v632_v13, %v630_v12 }
 0x1a4   : > { %1182 = vmatpush1.bf16.msra.mxu0 %v1181_v18  ;;  %v634_v18 = vld [vmem:[%s1936_s3 + $0x1c0] sm:$0xff] }
 0x1a5   : > { %1184 = vmatprep.subr.bf16.mxu0 %v1183_v41  ;;  %v640_v41 = vld [vmem:[%s1936_s3 + $0x1f0] sm:$0xff] }
 0x1a6   : > { %v1209_v43 = vpack.c.bf16 %v640_v41, %v638_v40 }
 0x1a8   : > { %1186 = vmatpush1.bf16.msra.mxu0 %v1185_v46 }
 0x1a9   : > { %1188 = vmatprep.subr.bf16.mxu0 %v1187_v50 }
 0x1ac   : > { %1190 = vmatpush1.bf16.msra.mxu0 %v1189_v58 }
 0x1ad   : > { %1192 = vmatprep.subr.bf16.mxu0 %v1191_v62 }
 0x1b0   : > { %1194 = vmatpush1.bf16.msra.mxu0 %v1193_v2 }
 0x1b1   : > { %1196 = vmatprep.subr.bf16.mxu0 %v1195_v5 }
 0x1b4   : > { %1198 = vmatpush1.bf16.msra.mxu0 %v1197_v8 }
 0x1b5   : > { %1200 = vmatprep.subr.bf16.mxu0 %v1199_v11 }
 0x1b8   : > { %1202 = vmatpush1.bf16.msra.mxu0 %v1201_v14 }
 0x265   : > { %v544_v21 = vpop.f32.mrb[2].mxu1 }
 0x266   : > { %v1654_v22 = vadd.f32 %v555_v19, %v544_v21  ;;  %v546_v23 = vpop.f32.mrb[3].mxu1  ;;  %v1203_v19 = vpack.c.bf16 %v637_v17, %v635_v16  ;;  %v639_v21 = vld [vmem:[%s1936_s3 + $0x1e8] sm:$0xff] }
 0x267   : > { %v1656_v24 = vadd.f32 %v556_v20, %v546_v23  ;;  %v636_v20 = vld [vmem:[%s1936_s3 + $0x1d0] sm:$0xff]  ;;  %v641_v23 = vld [vmem:[%s1936_s3 + $0x1f8] sm:$0xff] }
 0x268   : > { %v559_v25 = vmax.f32 %v1654_v22, 0.0  ;;  %v1207_v37 = vpack.c.bf16 %v641_v23, %v639_v21  ;;  %1204 = vmatprep.subr.bf16.mxu0 %v1203_v19 }
 0x269   : > { %v560_v26 = vmax.f32 %v1656_v24, 0.0  ;;  %v550_v3 = vpop.f32.mrb[4].mxu1 }
 0x26a   : > { %v552_v4 = vpop.f32.mrb[5].mxu1  ;;  %v561_v5 = vadd.f32 1e-05, %v550_v3 }
 0x26b   : > { %v563_v30 = vmax.f32 %v559_v25, %v560_v26  ;;  %v562_v38 = vadd.f32 1e-05, %v552_v4 }
 0x26d   : > { %564 = vmax.xlane.f32.xlu0 %v563_v30  ;;  %v1205_v30 = vpack.c.bf16 %v636_v20, %v634_v18 }
 0x26f   : > { %1206 = vmatpush1.bf16.msra.mxu0 %v1205_v30 }
 0x270   : > { %1208 = vmatprep.subr.bf16.mxu0 %v1207_v37 }
 0x273   : > { %1210 = vmatpush1.bf16.msra.mxu0 %v1209_v43 }
 0x2fa   : > { %v565_v46 = vpop.xlane.xlu0 %564 }
 0x2fb   : > { %v566_v47 = vrot.slane %v565_v46, 4 }
 0x2fd   : > { %v567_v48 = vmax.f32 %v565_v46, %v566_v47 }
 0x2ff   : > { %v568_v50 = vrot.slane %v567_v48, 2 }
 0x301   : > { %v569_v51 = vmax.f32 %v567_v48, %v568_v50 }
 0x303   : > { %v570_v57 = vrot.slane %v569_v51, 1 }
 0x305   : > { %v571_v58 = vmax.f32 %v569_v51, %v570_v57 }
 0x307   : > { %v572_v59 = vsub.f32 %v559_v25, %v571_v58  ;;  %v573_v60 = vsub.f32 %v560_v26, %v571_v58 }
 0x309   : > { %v574_v62 = vmul.f32 1.442695, %v572_v59  ;;  %v576_v63 = vmul.f32 1.442695, %v573_v60 }
 0x30b   : > { %1262 = vpow2.f32 %v574_v62 }
 0x30c   : > { %1264 = vpow2.f32 %v576_v63 }
 0x30d   : > { %1266 = vrcp.f32 %v561_v5 }
 0x30e   : > { %1268 = vrcp.f32 %v562_v38 }
 0x315   : > { %v1263_v39 = vpop.eup %1262 }
 0x316   : > { %v1265_v2 = vpop.eup %1264 }
 0x317   : > { %706 = vmatprep.mubr.f32.mxu0 %v1265_v2  ;;  %v1267_v24 = vpop.eup %1266 }
 0x318   : > { %707 = vmatmul.mubr.f32.vlgmr.msra.gmra.mrb[0].mxu0 %v1263_v39  ;;  %v1269_v25 = vpop.eup %1268 }
 0x3eb   : > { %v708_v6 = vpop.f32.mrb[0].mxu0 }
 0x3ec   : > { %1270 = vrcp.f32 %v708_v6  ;;  %v710_v22 = vpop.f32.mrb[1].mxu0 }
 0x3ed   : > { %1272 = vrcp.f32 %v710_v22 }
 0x3f6   : > { %v1271_v26 = vpop.eup %1270 }
 0x3f7   : > { %v1273_v8 = vpop.eup %1272  ;;  %v714_v9 = vmul.f32 %v1271_v26, %v1263_v39 }
 0x3f8   : > { %v716_v10 = vmul.f32 %v1273_v8, %v1265_v2 }
 0x3f9   : > { %v1757_v11 = vmul.f32 %v1267_v24, %v714_v9 }
 0x3fa   : > { %v720_v12 = vmul.f32 %v1269_v25, %v716_v10 }
 0x3fb   : > { %754 = vrot.lane.b32.xlu0 %v1757_v11, %s1287_s27  ;;  %722 = vrot.lane.b32.xlu1 %v1757_v11, %s1284_s24 }
 0x3ff   : > { %730 = vrot.lane.b32.xlu1 %v1757_v11, %s1283_s23  ;;  %780 = vrot.lane.b32.xlu0 %v720_v12, %s1290_s30 }
 0x403   : > { %738 = vrot.lane.b32.xlu1 %v1757_v11, %s1285_s25 }
 0x407   : > { %746 = vrot.lane.b32.xlu1 %v1757_v11, %s1286_s26 }
 0x40b   : > { %762 = vrot.lane.b32.xlu1 %v1757_v11, %s1288_s28 }
 0x40f   : > { %770 = vrot.lane.b32.xlu1 %v1757_v11, %s1289_s29 }
 0x413   : > { %724 = vrot.lane.b32.xlu1 %v720_v12, %s1284_s24 }
 0x417   : > { %732 = vrot.lane.b32.xlu1 %v720_v12, %s1283_s23 }
 0x41b   : > { %740 = vrot.lane.b32.xlu1 %v720_v12, %s1285_s25 }
 0x41f   : > { %748 = vrot.lane.b32.xlu1 %v720_v12, %s1286_s26 }
 0x423   : > { %756 = vrot.lane.b32.xlu1 %v720_v12, %s1287_s27 }
 0x427   : > { %764 = vrot.lane.b32.xlu1 %v720_v12, %s1288_s28 }
 0x42b   : > { %772 = vrot.lane.b32.xlu1 %v720_v12, %s1289_s29 }
 0x42f   : > { %778 = vrot.lane.b32.xlu1 %v1757_v11, %s1290_s30 }
 0x46d   : > { %v723_v13 = vpop.permute.xlu1 %722  ;;  %v755_v3 = vpop.permute.xlu0 %754 }
 0x471   : > { %v731_v14 = vpop.permute.xlu1 %730 }
 0x475   : > { %v739_v16 = vpop.permute.xlu1 %738 }
 0x479   : > { %v747_v17 = vpop.permute.xlu1 %746 }
 0x47d   : > { %v763_v18 = vpop.permute.xlu1 %762 }
 0x481   : > { %v771_v19 = vpop.permute.xlu1 %770 }
 0x485   : > { %v725_v20 = vpop.permute.xlu1 %724 }
 0x486   : > { %v726_v21 = vsel %vm298_vm4, %v723_v13, %v725_v20  ;;  %v727_v23 = vsel %vm298_vm4, %v725_v20, %v723_v13 }
 0x487   : > { %v728_v41 = vmul.f32 %v727_v23, %v1438_v53  ;;  %v729_v42 = vmul.f32 %v726_v21, %v1441_v54  ;;  %v781_v23 = vpop.permute.xlu0 %780 }
 0x489   : > { %v733_v30 = vpop.permute.xlu1 %732 }
 0x48a   : > { %v734_v37 = vsel %vm320_vm1, %v731_v14, %v733_v30  ;;  %v735_v40 = vsel %vm320_vm1, %v733_v30, %v731_v14 }
 0x48b   : > { %v736_v43 = vmul.f32 %v735_v40, %v1416_v44  ;;  %v737_v46 = vmul.f32 %v734_v37, %v1419_v45 }
 0x48d   : > { %v1213_v47 = vpack.c.bf16 %v736_v43, %v728_v41  ;;  %v741_v48 = vpop.permute.xlu1 %740  ;;  %v1211_v50 = vpack.c.bf16 %v737_v46, %v729_v42  ;;  %v721_v43 = vld [vmem:[%s1934_s1 + $0x18] sm:$0xff] }
 0x48e   : > { %v742_v51 = vsel %vm342_vm2, %v739_v16, %v741_v48  ;;  %v743_v57 = vsel %vm342_vm2, %v741_v48, %v739_v16 }
 0x48f   : > { %1212 = vmatprep.subr.bf16.mxu1 %v1211_v50  ;;  %v744_v62 = vmul.f32 %v743_v57, %v1469_v7  ;;  %v745_v63 = vmul.f32 %v742_v51, %v1444_v55  ;;  %v863_v51 = vld [vmem:[%s1935_s2 + $0x8] sm:$0xff] }
 0x490   : > { %1214 = vmatpush1.bf16.msra.mxu1 %v1213_v47  ;;  %v862_v47 = vld [vmem:[%s1935_s2] sm:$0xff] }
 0x491   : > { %v749_v58 = vpop.permute.xlu1 %748 }
 0x492   : > { %v750_v59 = vsel %vm364_vm3, %v747_v17, %v749_v58  ;;  %v751_v60 = vsel %vm364_vm3, %v749_v58, %v747_v17 }
 0x493   : > { %v752_v39 = vmul.f32 %v751_v60, %v1447_v56  ;;  %v753_v2 = vmul.f32 %v750_v59, %v1434_v52 }
 0x495   : > { %v1217_v4 = vpack.c.bf16 %v752_v39, %v744_v62  ;;  %v757_v5 = vpop.permute.xlu1 %756  ;;  %v1215_v38 = vpack.c.bf16 %v753_v2, %v745_v63 }
 0x496   : > { %v758_v6 = vsel %vm386_vm5, %v755_v3, %v757_v5  ;;  %v759_v22 = vsel %vm386_vm5, %v757_v5, %v755_v3 }
 0x497   : > { %v760_v24 = vmul.f32 %v758_v6, %v1476_v15  ;;  %v761_v25 = vmul.f32 %v759_v22, %v1453_v61  ;;  %1216 = vmatprep.subr.bf16.mxu1 %v1215_v38 }
 0x498   : > { %1218 = vmatpush1.bf16.msra.mxu1 %v1217_v4 }
 0x499   : > { %v1221_v26 = vpack.c.bf16 %v760_v24, %v1757_v11  ;;  %v765_v8 = vpop.permute.xlu1 %764  ;;  %v1219_v9 = vpack.c.bf16 %v761_v25, %v720_v12 }
 0x49a   : > { %v766_v10 = vsel %vm408_vm6, %v763_v18, %v765_v8  ;;  %v767_v13 = vsel %vm408_vm6, %v765_v8, %v763_v18 }
 0x49b   : > { %1220 = vmatprep.subr.bf16.mxu1 %v1219_v9  ;;  %v768_v20 = vmul.f32 %v766_v10, %v1493_v27  ;;  %v769_v11 = vmul.f32 %v767_v13, %v1496_v28 }
 0x49c   : > { %1222 = vmatpush1.bf16.msra.mxu1 %v1221_v26 }
 0x49d   : > { %v773_v14 = vpop.permute.xlu1 %772 }
 0x49e   : > { %v774_v16 = vsel %vm430_vm7, %v771_v19, %v773_v14  ;;  %v775_v17 = vsel %vm430_vm7, %v773_v14, %v771_v19 }
 0x49f   : > { %v776_v12 = vmul.f32 %v774_v16, %v1501_v33  ;;  %v777_v21 = vmul.f32 %v775_v17, %v1504_v34 }
 0x4a1   : > { %v1225_v30 = vpack.c.bf16 %v776_v12, %v768_v20  ;;  %v779_v37 = vpop.permute.xlu1 %778  ;;  %v1223_v18 = vpack.c.bf16 %v777_v21, %v769_v11 }
 0x4a2   : > { %v783_v40 = vsel %vm452_vm8, %v781_v23, %v779_v37  ;;  %v782_v41 = vsel %vm452_vm8, %v779_v37, %v781_v23 }
 0x4a3   : > { %v785_v19 = vmul.f32 %v783_v40, %v1520_v49  ;;  %1224 = vmatprep.subr.bf16.mxu1 %v1223_v18  ;;  %v784_v42 = vmul.f32 %v782_v41, %v1527_v1 }
 0x4a4   : > { %1226 = vmatpush1.bf16.msra.mxu1 %v1225_v30 }
 0x4a5   : > { %805 = vmatprep.subr.mxu1 %v785_v19 }
 0x4a8   : > { %806 = vmatpush1.msra.mxu1 %v784_v42 }
 0x4a9   : > { %1111 = vmatmul.mubr.msk.f32.vlgmr.msra.gmra.mrb[6].mxu1 %vm215_vm0, %v721_v43 }
 0x4aa   : > { %998 = vmatprep.mubr.f32.mxu1 %v1282_v0 }
 0x57c   : > { %v855_v46 = vpop.f32.mrb[6].mxu1 }
 0x57d   : > { %v860_v48 = vmul.f32 %v855_v46, %v1357_v29  ;;  %v857_v50 = vpop.f32.mrb[7].mxu1 }
 0x57e   : > { %v861_v57 = vmul.f32 %v857_v50, %v1363_v31 }
 0x57f   : > { %v1845_v58 = vmul.f32 %v862_v47, %v860_v48 }
 0x580   : > { %v865_v59 = vmul.f32 %v863_v51, %v861_v57 }
 0x581   : > { %867 = vrot.lane.b32.xlu1 %v1845_v58, %s1284_s24 }
 0x582   : > { %869 = vrot.lane.b32.xlu0 %v865_v59, %s1284_s24 }
 0x585   : > { %875 = vrot.lane.b32.xlu1 %v1845_v58, %s1283_s23 }
 0x586   : > { %877 = vrot.lane.b32.xlu0 %v865_v59, %s1283_s23 }
 0x589   : > { %883 = vrot.lane.b32.xlu1 %v1845_v58, %s1285_s25 }
 0x58a   : > { %885 = vrot.lane.b32.xlu0 %v865_v59, %s1285_s25  ;;  %s1099_s25 = sshll.u32 %s1939_s16, 1 }
 0x58d   : > { %891 = vrot.lane.b32.xlu1 %v1845_v58, %s1286_s26 }
 0x58e   : > { %893 = vrot.lane.b32.xlu0 %v865_v59, %s1286_s26 }
 0x591   : > { %899 = vrot.lane.b32.xlu1 %v1845_v58, %s1287_s27 }
 0x592   : > { %901 = vrot.lane.b32.xlu0 %v865_v59, %s1287_s27 }
 0x595   : > { %907 = vrot.lane.b32.xlu1 %v1845_v58, %s1288_s28 }
 0x596   : > { %909 = vrot.lane.b32.xlu0 %v865_v59, %s1288_s28  ;;  %s195_s28 = scalar_lea.vmem %s1937_s4, %s1099_s25 }
 0x599   : > { %915 = vrot.lane.b32.xlu1 %v1845_v58, %s1289_s29 }
 0x59a   : > { %917 = vrot.lane.b32.xlu0 %v865_v59, %s1289_s29 }
 0x59d   : > { %923 = vrot.lane.b32.xlu1 %v1845_v58, %s1290_s30 }
 0x59e   : > { %925 = vrot.lane.b32.xlu0 %v865_v59, %s1290_s30 }
 0x5f3   : > { %v868_v0 = vpop.permute.xlu1 %867 }
 0x5f4   : > { %v870_v29 = vpop.permute.xlu0 %869 }
 0x5f5   : > { %v871_v31 = vsel %vm298_vm4, %v868_v0, %v870_v29  ;;  %v872_v60 = vsel %vm298_vm4, %v870_v29, %v868_v0 }
 0x5f6   : > { %v873_v3 = vmul.f32 %v872_v60, %v1438_v53  ;;  %v874_v4 = vmul.f32 %v871_v31, %v1441_v54 }
 0x5f7   : > { %v876_v62 = vpop.permute.xlu1 %875 }
 0x5f8   : > { %v878_v63 = vpop.permute.xlu0 %877 }
 0x5f9   : > { %v879_v39 = vsel %vm320_vm1, %v876_v62, %v878_v63  ;;  %v880_v2 = vsel %vm320_vm1, %v878_v63, %v876_v62 }
 0x5fa   : > { %v881_v5 = vmul.f32 %v880_v2, %v1416_v44  ;;  %v882_v38 = vmul.f32 %v879_v39, %v1419_v45 }
 0x5fb   : > { %v884_v6 = vpop.permute.xlu1 %883 }
 0x5fc   : > { %v1229_v22 = vpack.c.bf16 %v881_v5, %v873_v3  ;;  %v886_v24 = vpop.permute.xlu0 %885  ;;  %v1227_v25 = vpack.c.bf16 %v882_v38, %v874_v4 }
 0x5fd   : > { %v887_v26 = vsel %vm342_vm2, %v884_v6, %v886_v24  ;;  %v888_v8 = vsel %vm342_vm2, %v886_v24, %v884_v6 }
 0x5fe   : > { %1228 = vmatprep.subr.bf16.mxu1 %v1227_v25  ;;  %v889_v45 = vmul.f32 %v888_v8, %v1469_v7  ;;  %v890_v10 = vmul.f32 %v887_v26, %v1444_v55 }
 0x5ff   : > { %v892_v9 = vpop.permute.xlu1 %891  ;;  %1230 = vmatpush1.bf16.msra.mxu1 %v1229_v22 }
 0x600   : > { %v894_v53 = vpop.permute.xlu0 %893 }
 0x601   : > { %v895_v54 = vsel %vm364_vm3, %v892_v9, %v894_v53  ;;  %v896_v44 = vsel %vm364_vm3, %v894_v53, %v892_v9 }
 0x602   : > { %v897_v13 = vmul.f32 %v896_v44, %v1447_v56  ;;  %v898_v14 = vmul.f32 %v895_v54, %v1434_v52 }
 0x603   : > { %v900_v16 = vpop.permute.xlu1 %899 }
 0x604   : > { %v1233_v17 = vpack.c.bf16 %v897_v13, %v889_v45  ;;  %v902_v20 = vpop.permute.xlu0 %901  ;;  %v1231_v11 = vpack.c.bf16 %v898_v14, %v890_v10 }
 0x605   : > { %v903_v12 = vsel %vm386_vm5, %v900_v16, %v902_v20  ;;  %v904_v21 = vsel %vm386_vm5, %v902_v20, %v900_v16 }
 0x606   : > { %v905_v23 = vmul.f32 %v903_v12, %v1476_v15  ;;  %v906_v7 = vmul.f32 %v904_v21, %v1453_v61  ;;  %1232 = vmatprep.subr.bf16.mxu1 %v1231_v11 }
 0x607   : > { %v908_v55 = vpop.permute.xlu1 %907  ;;  %1234 = vmatpush1.bf16.msra.mxu1 %v1233_v17 }
 0x608   : > { %v1237_v56 = vpack.c.bf16 %v905_v23, %v1845_v58  ;;  %v910_v52 = vpop.permute.xlu0 %909  ;;  %v1235_v30 = vpack.c.bf16 %v906_v7, %v865_v59 }
 0x609   : > { %v911_v37 = vsel %vm408_vm6, %v908_v55, %v910_v52  ;;  %v912_v18 = vsel %vm408_vm6, %v910_v52, %v908_v55 }
 0x60a   : > { %1236 = vmatprep.subr.bf16.mxu1 %v1235_v30  ;;  %v913_v19 = vmul.f32 %v911_v37, %v1493_v27  ;;  %v914_v42 = vmul.f32 %v912_v18, %v1496_v28  ;;  %v866_v28 = vld [vmem:[%s1934_s1 + $0x20] sm:$0xff] }
 0x60b   : > { %v916_v40 = vpop.permute.xlu1 %915  ;;  %1238 = vmatpush1.bf16.msra.mxu1 %v1237_v56 }
 0x60c   : > { %v918_v41 = vpop.permute.xlu0 %917 }
 0x60d   : > { %v919_v61 = vsel %vm430_vm7, %v916_v40, %v918_v41  ;;  %v920_v15 = vsel %vm430_vm7, %v918_v41, %v916_v40 }
 0x60e   : > { %v921_v43 = vmul.f32 %v919_v61, %v1501_v33  ;;  %v922_v46 = vmul.f32 %v920_v15, %v1504_v34 }
 0x60f   : > { %v924_v47 = vpop.permute.xlu1 %923 }
 0x610   : > { %v1241_v48 = vpack.c.bf16 %v921_v43, %v913_v19  ;;  %v926_v50 = vpop.permute.xlu0 %925  ;;  %v1239_v51 = vpack.c.bf16 %v922_v46, %v914_v42 }
 0x611   : > { %v928_v57 = vsel %vm452_vm8, %v926_v50, %v924_v47  ;;  %v927_v58 = vsel %vm452_vm8, %v924_v47, %v926_v50 }
 0x612   : > { %v930_v59 = vmul.f32 %v928_v57, %v1520_v49  ;;  %1240 = vmatprep.subr.bf16.mxu1 %v1239_v51  ;;  %v929_v27 = vmul.f32 %v927_v58, %v1527_v1  ;;  %v1291_v49 = vmov 1966171168  }
 0x613   : > { %1242 = vmatpush1.bf16.msra.mxu1 %v1241_v48  ;;  %v1021_v60 = vunpack.c.l.s4 %v1291_v49 }
 0x614   : > { %950 = vmatprep.subr.mxu1 %v930_v59 }
 0x615   : > { %v1022_v2 = vunpack.c.0.s8 %v1021_v60 }
 0x617   : > { %951 = vmatpush1.msra.mxu1 %v929_v27  ;;  %v1025_v6 = vsub.s32 %v1022_v2, %v1394_v35 }
 0x618   : > { %1112 = vmatmul.mubr.msk.f32.vlgmr.msra.gmra.mrb[8].mxu1 %vm215_vm0, %v866_v28 }
 0x6eb   : > { %v1000_v33 = vpop.f32.mrb[8].mxu1 }
 0x6ec   : > { %v1005_v34 = vrot.slane %v1000_v33, 4  ;;  %v1002_v0 = vpop.f32.mrb[9].mxu1 }
 0x6ed   : > { %v1011_v36 = vrot.slane %v1002_v0, 4 }
 0x6ee   : > { %v1006_v29 = vadd.f32 %v1005_v34, %v1000_v33 }
 0x6ef   : > { %v1012_v31 = vadd.f32 %v1011_v36, %v1002_v0 }
 0x6f0   : > { %v1007_v62 = vrot.slane %v1006_v29, 2 }
 0x6f1   : > { %v1013_v63 = vrot.slane %v1012_v31, 2 }
 0x6f2   : > { %v1008_v39 = vadd.f32 %v1007_v62, %v1006_v29 }
 0x6f3   : > { %v1014_v1 = vadd.f32 %v1013_v63, %v1012_v31 }
 0x6f4   : > { %v1009_v3 = vrot.slane %v1008_v39, 1 }
 0x6f5   : > { %v1015_v4 = vrot.slane %v1014_v1, 1 }
 0x6f6   : > { %v1010_v5 = vadd.f32 %v1009_v3, %v1008_v39 }
 0x6f7   : > { %v1016_v38 = vadd.f32 %v1015_v4, %v1014_v1 }
 0x6f9   : > { %v1019_v22 = vcombine.low %v1010_v5, %v1016_v38 }
 0x6fb   : > { %v1026_v24 = vrot.slane %v1019_v22, %v1025_v6 }
 0x6fd   : > { %v1033_v25 = vrot.slane %v1026_v24, %v1025_v6 }
 0x6ff   : > { %1039 = vst.msk [vmem:[%s195_s28] sm:$0x3] %vm1037_vm9, %v1033_v25 }
 0x700 PF: > { %s14_s15 = sadd.s32 1, %s1280_s15  }
 0x701   : > { %p11_p4 = scmp.ge.s32.totalorder %s14_s15, 4  }
 0x703   :  { %13 = sbr.rel (!%p11_p4) target bundleno = 1 (0x1), region = 74 }

</bundles_post_ra>
